<compile_context>
chip_gen: v7x
topology: tpu7x:2x2x1
jax: 0.10.0
libtpu: 0.0.40
codegen_flags: <defaults>
</compile_context>

<pallas_src>
import math

import jax
import jax.numpy as jnp
from jax.experimental import pallas as pl
from jax.experimental.pallas import tpu as pltpu


def graphsage_kernel(adj_ref, xn_ref, xs_ref, ws_ref, wn_ref, wc_ref,
                     out_ref, acc_ref, deg_ref):
    # adj_ref: (TN, TK) int8 0/1     xn_ref: (TK, F)   neighbor-column features
    # xs_ref : (TN, F)  self feats   ws_ref: (F, D)    wn_ref: (F, D)   wc_ref: (D, C)
    # out_ref: (TN, C)               acc_ref: (TN, F)  deg_ref: (TN, 1)
    k = pl.program_id(1)

    @pl.when(k == 0)
    def _():
        acc_ref[...] = jnp.zeros_like(acc_ref)
        deg_ref[...] = jnp.zeros_like(deg_ref)

    a = adj_ref[...].astype(jnp.float32)                              # 0/1 tile
    acc_ref[...] += jnp.dot(a, xn_ref[...],
                            preferred_element_type=jnp.float32)       # sum_j adj*x_j
    deg_ref[...] += jnp.sum(a, axis=1, keepdims=True)                 # neighbor count

    @pl.when(k == pl.num_programs(1) - 1)
    def _():
        deg = deg_ref[...]
        inv_deg = jnp.where(deg > 0, 1.0 / deg, 0.0)                  # guard empty rows
        neigh = acc_ref[...] * inv_deg                                # mean aggregation
        # concat([self, neigh]) @ W_enc.T  ==  self @ W_self + neigh @ W_neigh
        h = jnp.dot(xs_ref[...], ws_ref[...], preferred_element_type=jnp.float32)
        h = h + jnp.dot(neigh, wn_ref[...], preferred_element_type=jnp.float32)
        h = jnp.maximum(h, 0.0)                                       # ReLU (Encoder)
        out_ref[...] = jnp.dot(h, wc_ref[...],
                               preferred_element_type=jnp.float32)    # classifier


def graphsage_sup_forward(x, adj_mask, W_enc, W_cls, *, tn=128, tk=128,
                          vmem_limit_bytes=48 * 1024 * 1024):
    """x: (N, F) f32, adj_mask: (N, N) int8 0/1, W_enc: (D, 2F), W_cls: (C, D)."""
    N, F = x.shape
    D, two_f = W_enc.shape
    assert two_f == 2 * F
    C = W_cls.shape[0]
    assert adj_mask.shape == (N, N)
    tn = min(tn, N)
    tk = min(tk, N)
    assert N % tn == 0 and N % tk == 0

    # torch layout is W_enc.mm(cat([self, neigh]).t()); split + transpose once here.
    w_self = W_enc[:, :F].T        # (F, D)
    w_neigh = W_enc[:, F:].T       # (F, D)
    w_cls_t = W_cls.T              # (D, C)

    grid = (N // tn, N // tk)      # (row tiles, neighbor-column tiles)
    return pl.pallas_call(
        graphsage_kernel,
        out_shape=jax.ShapeDtypeStruct((N, C), jnp.float32),
        grid_spec=pltpu.PrefetchScalarGridSpec(
            num_scalar_prefetch=0,
            grid=grid,
            in_specs=[
                pl.BlockSpec((tn, tk), lambda i, k: (i, k)),   # adjacency tile (int8)
                pl.BlockSpec((tk, F), lambda i, k: (k, 0)),    # neighbor-column feats
                pl.BlockSpec((tn, F), lambda i, k: (i, 0)),    # self feats (row tile)
                pl.BlockSpec((F, D), lambda i, k: (0, 0)),     # W_self
                pl.BlockSpec((F, D), lambda i, k: (0, 0)),     # W_neigh
                pl.BlockSpec((D, C), lambda i, k: (0, 0)),     # W_cls^T
            ],
            out_specs=pl.BlockSpec((tn, C), lambda i, k: (i, 0)),
            scratch_shapes=[
                pltpu.VMEM((tn, F), jnp.float32),              # neighbor-sum accumulator
                pltpu.VMEM((tn, 1), jnp.float32),              # degree accumulator
            ],
        ),
        compiler_params=pltpu.CompilerParams(
            dimension_semantics=("parallel", "arbitrary"),
            vmem_limit_bytes=vmem_limit_bytes,                 # safe on v5e/v6e/v7x
        ),
    )(adj_mask, x, x, w_self, w_neigh, w_cls_t)


def _xavier_normal(key, shape):
    fan_out, fan_in = shape
    std = math.sqrt(2.0 / (fan_in + fan_out))
    return std * jax.random.normal(key, shape, jnp.float32)


if __name__ == "__main__":
    N, F, D, C = 256, 128, 64, 8   # nodes, feat dim, embed dim, num classes
    key = jax.random.PRNGKey(0)
    kx, k1, k2 = jax.random.split(key, 3)
    x = jax.random.normal(kx, (N, F), jnp.float32)

    # Deterministic adjacency (int8 0/1): each node has 3 neighbors, no self loops.
    eye = jnp.eye(N, dtype=jnp.int8)
    adj = jnp.clip(jnp.roll(eye, 1, axis=1)
                   + jnp.roll(eye, 5, axis=1)
                   + jnp.roll(eye, N // 2, axis=1), 0, 1).astype(jnp.int8)

    # Parameters in the torch layout: Encoder.weight (D, 2F), graphsage_sup.weight (C, D).
    W_enc = _xavier_normal(k1, (D, 2 * F))
    W_cls = _xavier_normal(k2, (C, D))

    fwd = jax.jit(graphsage_sup_forward)
    out = jax.block_until_ready(fwd(x, adj, W_enc, W_cls))

    # Pure-JAX reference of the same forward pass.
    a = adj.astype(jnp.float32)
    deg = jnp.sum(a, axis=1, keepdims=True)
    neigh = (a @ x) / deg
    combined = jnp.concatenate([x, neigh], axis=1)
    embeds = jnp.maximum(combined @ W_enc.T, 0.0)
    ref = embeds @ W_cls.T

    assert out.shape == (N, C)
    assert bool(jnp.allclose(out, ref, atol=1e-3, rtol=1e-3))
    print("KERNEL_OK")
</pallas_src>

<mosaic_0001>
module attributes {stable_mosaic.version = 11 : i64} {
  func.func @graphsage_kernel(%arg0: i32, %arg1: i32, %arg2: memref<128x128xi8, #tpu.memory_space<vmem>>, %arg3: memref<128x128xf32, #tpu.memory_space<vmem>>, %arg4: memref<128x128xf32, #tpu.memory_space<vmem>>, %arg5: memref<128x64xf32, #tpu.memory_space<vmem>>, %arg6: memref<128x64xf32, #tpu.memory_space<vmem>>, %arg7: memref<64x8xf32, #tpu.memory_space<vmem>>, %arg8: memref<128x8xf32, #tpu.memory_space<vmem>>, %arg9: memref<128x128xf32, #tpu.memory_space<vmem>>, %arg10: memref<128x1xf32, #tpu.memory_space<vmem>>) attributes {dimension_semantics = [#tpu.dimension_semantics<parallel>, #tpu.dimension_semantics<arbitrary>], iteration_bounds = array<i64: 2, 2>, scalar_prefetch = 0 : i64, scratch_operands = 2 : i64, tpu.core_type = #tpu.core_type<tc>, window_params = [{transform_indices = @transform_0, window_bounds = array<i64: 128, 128>}, {transform_indices = @transform_1, window_bounds = array<i64: 128, 128>}, {transform_indices = @transform_2, window_bounds = array<i64: 128, 128>}, {pipeline_mode = #tpu.pipeline_mode<synchronous>, transform_indices = @transform_3, window_bounds = array<i64: 128, 64>}, {pipeline_mode = #tpu.pipeline_mode<synchronous>, transform_indices = @transform_4, window_bounds = array<i64: 128, 64>}, {pipeline_mode = #tpu.pipeline_mode<synchronous>, transform_indices = @transform_5, window_bounds = array<i64: 64, 8>}, {transform_indices = @transform_6, window_bounds = array<i64: 128, 8>}]} {
    %c0_i32 = arith.constant 0 : i32
    %0 = arith.cmpi eq, %arg1, %c0_i32 : i32
    %1 = arith.extui %0 : i1 to i32
    %c0_i32_0 = arith.constant 0 : i32
    %2 = arith.cmpi ne, %1, %c0_i32_0 : i32
    scf.if %2 {
      %cst_14 = arith.constant 0.000000e+00 : f32
      %18 = vector.broadcast %cst_14 : f32 to vector<128x128xf32>
      %c0_15 = arith.constant 0 : index
      %c0_16 = arith.constant 0 : index
      %19 = vector.load %arg9[%c0_15, %c0_16] : memref<128x128xf32, #tpu.memory_space<vmem>>, vector<128x128xf32>
      tpu.vector_store %arg9[%c0_15, %c0_16], %18 {strides = array<i32>} : memref<128x128xf32, #tpu.memory_space<vmem>>, vector<128x128xf32>,
      %cst_17 = arith.constant 0.000000e+00 : f32
      %20 = vector.broadcast %cst_17 : f32 to vector<128x1xf32>
      %c0_18 = arith.constant 0 : index
      %c0_19 = arith.constant 0 : index
      %21 = vector.load %arg10[%c0_18, %c0_19] : memref<128x1xf32, #tpu.memory_space<vmem>>, vector<128x1xf32>
      tpu.vector_store %arg10[%c0_18, %c0_19], %20 {strides = array<i32>} : memref<128x1xf32, #tpu.memory_space<vmem>>, vector<128x1xf32>,
    } else {
    }
    %c0 = arith.constant 0 : index
    %c0_1 = arith.constant 0 : index
    %3 = vector.load %arg2[%c0, %c0_1] : memref<128x128xi8, #tpu.memory_space<vmem>>, vector<128x128xi8>
    %4 = arith.sitofp %3 : vector<128x128xi8> to vector<128x128xf32>
    %c0_2 = arith.constant 0 : index
    %c0_3 = arith.constant 0 : index
    %5 = vector.load %arg9[%c0_2, %c0_3] : memref<128x128xf32, #tpu.memory_space<vmem>>, vector<128x128xf32>
    %c0_4 = arith.constant 0 : index
    %c0_5 = arith.constant 0 : index
    %6 = vector.load %arg3[%c0_4, %c0_5] : memref<128x128xf32, #tpu.memory_space<vmem>>, vector<128x128xf32>
    %cst = arith.constant dense<0.000000e+00> : vector<128x128xf32>
    %7 = tpu.matmul %4, %6, %cst {dimension_numbers = #tpu.dot_dimension_numbers<[1], [0], [0], [1], [0, 0, 1, 1], [], []>} : vector<128x128xf32>, vector<128x128xf32>, vector<128x128xf32> -> vector<128x128xf32>
    %8 = arith.addf %5, %7 : vector<128x128xf32>
    %c0_6 = arith.constant 0 : index
    %c0_7 = arith.constant 0 : index
    %9 = vector.load %arg9[%c0_6, %c0_7] : memref<128x128xf32, #tpu.memory_space<vmem>>, vector<128x128xf32>
    tpu.vector_store %arg9[%c0_6, %c0_7], %8 {strides = array<i32>} : memref<128x128xf32, #tpu.memory_space<vmem>>, vector<128x128xf32>,
    %c0_8 = arith.constant 0 : index
    %c0_9 = arith.constant 0 : index
    %10 = vector.load %arg10[%c0_8, %c0_9] : memref<128x1xf32, #tpu.memory_space<vmem>>, vector<128x1xf32>
    %cst_10 = arith.constant dense<0.000000e+00> : vector<128xf32>
    %11 = vector.multi_reduction <add>, %4, %cst_10 [1] : vector<128x128xf32> to vector<128xf32>
    %12 = vector.shape_cast %11 : vector<128xf32> to vector<128x1xf32>
    %13 = arith.addf %10, %12 : vector<128x1xf32>
    %c0_11 = arith.constant 0 : index
    %c0_12 = arith.constant 0 : index
    %14 = vector.load %arg10[%c0_11, %c0_12] : memref<128x1xf32, #tpu.memory_space<vmem>>, vector<128x1xf32>
    tpu.vector_store %arg10[%c0_11, %c0_12], %13 {strides = array<i32>} : memref<128x1xf32, #tpu.memory_space<vmem>>, vector<128x1xf32>,
    %c1_i32 = arith.constant 1 : i32
    %15 = arith.cmpi eq, %arg1, %c1_i32 : i32
    %16 = arith.extui %15 : i1 to i32
    %c0_i32_13 = arith.constant 0 : i32
    %17 = arith.cmpi ne, %16, %c0_i32_13 : i32
    scf.if %17 {
      %c0_14 = arith.constant 0 : index
      %c0_15 = arith.constant 0 : index
      %18 = vector.load %arg10[%c0_14, %c0_15] : memref<128x1xf32, #tpu.memory_space<vmem>>, vector<128x1xf32>
      %cst_16 = arith.constant 0.000000e+00 : f32
      %19 = vector.broadcast %cst_16 : f32 to vector<128x1xf32>
      %20 = arith.cmpf ogt, %18, %19 : vector<128x1xf32>
      %cst_17 = arith.constant 1.000000e+00 : f32
      %21 = vector.broadcast %cst_17 : f32 to vector<128x1xf32>
      %22 = arith.divf %21, %18 : vector<128x1xf32>
      %cst_18 = arith.constant 0.000000e+00 : f32
      %23 = vector.broadcast %cst_18 : f32 to vector<128x1xf32>
      %24 = arith.select %20, %22, %23 : vector<128x1xi1>, vector<128x1xf32>
      %c0_19 = arith.constant 0 : index
      %c0_20 = arith.constant 0 : index
      %25 = vector.load %arg9[%c0_19, %c0_20] : memref<128x128xf32, #tpu.memory_space<vmem>>, vector<128x128xf32>
      %26 = vector.broadcast %24 : vector<128x1xf32> to vector<128x128xf32>
      %27 = arith.mulf %25, %26 : vector<128x128xf32>
      %c0_21 = arith.constant 0 : index
      %c0_22 = arith.constant 0 : index
      %28 = vector.load %arg4[%c0_21, %c0_22] : memref<128x128xf32, #tpu.memory_space<vmem>>, vector<128x128xf32>
      %c0_23 = arith.constant 0 : index
      %c0_24 = arith.constant 0 : index
      %29 = vector.load %arg5[%c0_23, %c0_24] : memref<128x64xf32, #tpu.memory_space<vmem>>, vector<128x64xf32>
      %cst_25 = arith.constant dense<0.000000e+00> : vector<128x64xf32>
      %30 = tpu.matmul %28, %29, %cst_25 {dimension_numbers = #tpu.dot_dimension_numbers<[1], [0], [0], [1], [0, 0, 1, 1], [], []>} : vector<128x128xf32>, vector<128x64xf32>, vector<128x64xf32> -> vector<128x64xf32>
      %c0_26 = arith.constant 0 : index
      %c0_27 = arith.constant 0 : index
      %31 = vector.load %arg6[%c0_26, %c0_27] : memref<128x64xf32, #tpu.memory_space<vmem>>, vector<128x64xf32>
      %cst_28 = arith.constant dense<0.000000e+00> : vector<128x64xf32>
      %32 = tpu.matmul %27, %31, %cst_28 {dimension_numbers = #tpu.dot_dimension_numbers<[1], [0], [0], [1], [0, 0, 1, 1], [], []>} : vector<128x128xf32>, vector<128x64xf32>, vector<128x64xf32> -> vector<128x64xf32>
      %33 = arith.addf %30, %32 : vector<128x64xf32>
      %cst_29 = arith.constant 0.000000e+00 : f32
      %34 = vector.broadcast %cst_29 : f32 to vector<128x64xf32>
      %35 = arith.maximumf %33, %34 : vector<128x64xf32>
      %c0_30 = arith.constant 0 : index
      %c0_31 = arith.constant 0 : index
      %36 = vector.load %arg7[%c0_30, %c0_31] : memref<64x8xf32, #tpu.memory_space<vmem>>, vector<64x8xf32>
      %cst_32 = arith.constant dense<0.000000e+00> : vector<128x8xf32>
      %37 = tpu.matmul %35, %36, %cst_32 {dimension_numbers = #tpu.dot_dimension_numbers<[1], [0], [0], [1], [0, 0, 1, 1], [], []>} : vector<128x64xf32>, vector<64x8xf32>, vector<128x8xf32> -> vector<128x8xf32>
      %c0_33 = arith.constant 0 : index
      %c0_34 = arith.constant 0 : index
      %38 = vector.load %arg8[%c0_33, %c0_34] : memref<128x8xf32, #tpu.memory_space<vmem>>, vector<128x8xf32>
      tpu.vector_store %arg8[%c0_33, %c0_34], %37 {strides = array<i32>} : memref<128x8xf32, #tpu.memory_space<vmem>>, vector<128x8xf32>,
    } else {
    }
    return
  }
  func.func @transform_0(%arg0: i32, %arg1: i32) -> (i32, i32) {
    %c0_i32 = arith.constant 0 : i32
    return %arg0, %arg1 : i32, i32
  }
  func.func @transform_1(%arg0: i32, %arg1: i32) -> (i32, i32) {
    %c0_i32 = arith.constant 0 : i32
    %c0_i32_0 = arith.constant 0 : i32
    return %arg1, %c0_i32 : i32, i32
  }
  func.func @transform_2(%arg0: i32, %arg1: i32) -> (i32, i32) {
    %c0_i32 = arith.constant 0 : i32
    %c0_i32_0 = arith.constant 0 : i32
    return %arg0, %c0_i32 : i32, i32
  }
  func.func @transform_3(%arg0: i32, %arg1: i32) -> (i32, i32) {
    %c0_i32 = arith.constant 0 : i32
    %c0_i32_0 = arith.constant 0 : i32
    %c0_i32_1 = arith.constant 0 : i32
    return %c0_i32, %c0_i32_0 : i32, i32
  }
  func.func @transform_4(%arg0: i32, %arg1: i32) -> (i32, i32) {
    %c0_i32 = arith.constant 0 : i32
    %c0_i32_0 = arith.constant 0 : i32
    %c0_i32_1 = arith.constant 0 : i32
    return %c0_i32, %c0_i32_0 : i32, i32
  }
  func.func @transform_5(%arg0: i32, %arg1: i32) -> (i32, i32) {
    %c0_i32 = arith.constant 0 : i32
    %c0_i32_0 = arith.constant 0 : i32
    %c0_i32_1 = arith.constant 0 : i32
    return %c0_i32, %c0_i32_0 : i32, i32
  }
  func.func @transform_6(%arg0: i32, %arg1: i32) -> (i32, i32) {
    %c0_i32 = arith.constant 0 : i32
    %c0_i32_0 = arith.constant 0 : i32
    return %arg0, %c0_i32 : i32, i32
  }
}

</mosaic_0001>

<bundles_post_ra>
// kernel: graphsage_sup_forward.1
= control target key start
LH: loop header
LB: loop body
LE: loop exit
PB: predicated region body
PF: predicated region fallthrough
CT: control target
= control target key end

     0   :  { %s2303_s21 = smov 0   ;;  %s2305_s22 = smov 0   ;;  %s2754_s0 = inlined_call_operand.vmem [shape: s8[256,256], index: 0, kind: input, shape index: {}]   ;;  %s2755_s1 = inlined_call_operand.vmem [shape: f32[256,128], index: 1, kind: input, shape index: {}, may-alias: {1,2}]   ;;  %s2756_s2 = inlined_call_operand.vmem [shape: f32[256,128], index: 2, kind: input, shape index: {}, may-alias: {1,2}]   ;;  %s2757_s3 = inlined_call_operand.vmem [shape: f32[128,64], index: 3, kind: input, shape index: {}]   ;;  %s2758_s4 = inlined_call_operand.vmem [shape: f32[128,64], index: 4, kind: input, shape index: {}]   ;;  %s2759_s5 = inlined_call_operand.vmem [shape: f32[64,8], index: 5, kind: input, shape index: {}]   ;;  %s2760_s6 = inlined_call_operand.vmem [shape: f32[256,8], index: 6, kind: output, shape index: {}]  }
   0x1   :  { %s2307_s23 = smov 0   ;;  %s2309_s24 = smov 0  }
   0x2   :  { %s2311_s25 = smov 0   ;;  %s2313_s26 = smov 0  }
   0x3   :  { %s2315_s27 = smov 0  }
   0x4 LB: > { %s25_s28 = sadd.s32 1, %s2256_s25  ;;  %s28_s29 = sadd.s32 1, %s2260_s26  ;;  %s2264_s27 = sphi %s2315_s27, %s16_s27   ;;  %s2260_s26 = sphi %s2313_s26, %s2766_s26   ;;  %s2256_s25 = sphi %s2311_s25, %s2765_s25   ;;  %s2252_s24 = sphi %s2309_s24, %s2764_s24   ;;  %s2248_s23 = sphi %s2307_s23, %s2763_s23   ;;  %s2244_s22 = sphi %s2305_s22, %s2762_s22   ;;  %s2240_s21 = sphi %s2303_s21, %s2761_s21  }
   0x5   : > { %p26_p0 = scmp.ge.s32.totalorder %s25_s28, 2  ;;  %p44_p1 = scmp.ne.s32.totalorder %s2244_s22, %s2240_s21 }
   0x6   : > { %p45_p2 = scmp.eq.s32.totalorder %s2264_s27, 0  ;;  %s37_s9 = sadd.s32 1, %s2244_s22 }
   0x7   : > { %s2768_s28 = smov (%p26_p0, %s25_s28), 0  ;;  %s2770_s29 = smov (!%p26_p0, %s28_s29), %s2260_s26 }
   0x8   : > { %p46_p3 = por %p45_p2, %p44_p1  ;;  %p30_p4 = scmp.ge.s32.totalorder %s2770_s29, 2 }
   0x9   : > { %s33_s30 = ssub.s32 %s2256_s25, %s2768_s28  ;;  %p1596_p6 = scmp.ge.s32.totalorder %s2264_s27, 4 }
   0xa   : > { %s2772_s29 = smov (%p30_p4, %s2770_s29), 0 }
   0xb   : > { %s32_s7 = ssub.s32 %s2260_s26, %s2772_s29  ;;  %220 = sbr.rel (%p1596_p6) target bundleno = 26 (0x1a), region = 28 }
   0xc   : > { %s34_s8 = sor.u32 %s33_s30, %s32_s7 }
   0xd   : > { %p35_p5 = scmp.eq.s32.totalorder %s34_s8, 0 }
   0xf   : > { %s2354_s10 = scalar_select %p35_p5, %s2244_s22, %s37_s9  }
  0x12   : > { %223 = sbr.rel (!%p46_p3) target bundleno = 26 (0x1a), region = 32  ;;  %s225_s11 = sand.u32 (%p46_p3), 1, %s2244_s22  }
  0x13   : > { %s1629_s12 = sshll.u32 (%p46_p3), %s2260_s26, 3  ;;  %s1597_s13 = sshll.u32 (%p46_p3), %s225_s11, 5 }
  0x14   : > { %s230_s14 = sadd.s32 (%p46_p3), %s2256_s25, %s1629_s12  ;;  %s227_s19 = scalar_lea.vmem (%p46_p3), [#allocation4], %s1597_s13 }
  0x15   : > { %s1600_s15 = sshll.u32 (%p46_p3), %s230_s14, 3 }
  0x16   : > { %s232_s18 = scalar_lea.vmem (%p46_p3), %s2754_s0, %s1600_s15 }
  0x17   : > { %v266_v0 = vld [vmem:[%s232_s18] sm:$0xff] (%p46_p3)  ;;  %v268_v1 = vld [vmem:[%s232_s18 + $0x10] sm:$0xff] (%p46_p3) }
  0x18   : > { %v270_v2 = vld [vmem:[%s232_s18 + $0x20] sm:$0xff] (%p46_p3)  ;;  %267 = vst [vmem:[%s227_s19] sm:$0xff] (%p46_p3), %v266_v0  ;;  %269 = vst [vmem:[%s227_s19 + $0x8] sm:$0xff] (%p46_p3), %v268_v1  ;;  %v272_v3 = vld [vmem:[%s232_s18 + $0x30] sm:$0xff] (%p46_p3) }
  0x19   : > { %271 = vst [vmem:[%s227_s19 + $0x10] sm:$0xff] %v270_v2  ;;  %273 = vst [vmem:[%s227_s19 + $0x18] sm:$0xff] %v272_v3 }
  0x1a PF: > { %p1601_p7 = scmp.ge.s32.totalorder %s2264_s27, 1  ;;  %p296_p8 = scmp.lt.s32.totalorder %s2264_s27, 5 }
  0x1c   : > { %p297_p9 = pnand %p1601_p7, %p296_p8 }
  0x1d   : > { %s303_s20 = sand.u32 (!%p297_p9), 1, %s2240_s21   ;;  %s1603_s30 = sshll.u32 (!%p297_p9), %s2248_s23, 4 }
  0x1e   : > { %300 = sbr.rel (%p297_p9) target bundleno = 933 (0x3a5), region = 78  ;;  %s1602_s7 = sshll.u32 (!%p297_p9), %s303_s20, 5 }
  0x1f   : > { %p344_p10 = scmp.lt.s32.totalorder (!%p297_p9), %s1603_s30, 31  ;;  %s1605_s8 = sshll.u32 (!%p297_p9), %s2252_s24, 4 }
  0x20   : > { %p350_p11 = scmp.lt.s32.totalorder (!%p297_p9), %s1605_s8, 31  ;;  %s2383_s24 = scalar_lea.vmem (!%p297_p9), [#allocation4], %s1602_s7 }
  0x21   : > { %p1609_p12 = scmp.ne.s32.totalorder (!%p297_p9), %s2248_s23, 0 }
  0x25   : > { %s2774_s30 = smov (!%p344_p10, %s1603_s30), 31  ;;  %s2776_s8 = smov (!%p350_p11, %s1605_s8), 31 }
  0x26   : > { %s1604_s9 = sshll.u32 %s2774_s30, 3  ;;  %s1606_s14 = sshll.u32 %s2776_s8, 3  ;;  %vm381_vm0 = vcmask (!%p1609_p12), 7168   ;;  %v2266_v4 = vmov (!%p1609_p12), 0.0  }
  0x27   : > { %s2371_s13 = scalar_lea.vmem %s2755_s1, %s1604_s9  ;;  %s2376_s17 = scalar_lea.vmem %s2756_s2, %s1606_s14  ;;  %365 = vst [vmem:[#allocation2] sm:$0xff] (!%p1609_p12), %v2266_v4  ;;  %366 = vst [vmem:[#allocation2 + $0x8] sm:$0xff] (!%p1609_p12), %v2266_v4 }
  0x28   : > { %s2381_s19 = scalar_lea.vmem %s2760_s6, %s1606_s14  ;;  %364 = sbr.rel (%p1609_p12) target bundleno = 55 (0x37), region = 86  ;;  %367 = vst [vmem:[#allocation2 + $0x10] sm:$0xff] (!%p1609_p12), %v2266_v4  ;;  %368 = vst [vmem:[#allocation2 + $0x18] sm:$0xff] (!%p1609_p12), %v2266_v4 }
  0x29   : > { %369 = vst [vmem:[#allocation2 + $0x20] sm:$0xff] (!%p1609_p12), %v2266_v4  ;;  %370 = vst [vmem:[#allocation2 + $0x28] sm:$0xff] (!%p1609_p12), %v2266_v4 }
  0x2a   : > { %371 = vst [vmem:[#allocation2 + $0x30] sm:$0xff] (!%p1609_p12), %v2266_v4  ;;  %372 = vst [vmem:[#allocation2 + $0x38] sm:$0xff] (!%p1609_p12), %v2266_v4 }
  0x2b   : > { %373 = vst [vmem:[#allocation2 + $0x40] sm:$0xff] (!%p1609_p12), %v2266_v4  ;;  %374 = vst [vmem:[#allocation2 + $0x48] sm:$0xff] (!%p1609_p12), %v2266_v4 }
  0x2c   : > { %375 = vst [vmem:[#allocation2 + $0x50] sm:$0xff] (!%p1609_p12), %v2266_v4  ;;  %376 = vst [vmem:[#allocation2 + $0x58] sm:$0xff] (!%p1609_p12), %v2266_v4 }
  0x2d   : > { %377 = vst [vmem:[#allocation2 + $0x60] sm:$0xff] (!%p1609_p12), %v2266_v4  ;;  %378 = vst [vmem:[#allocation2 + $0x68] sm:$0xff] (!%p1609_p12), %v2266_v4 }
  0x2e   : > { %379 = vst [vmem:[#allocation2 + $0x70] sm:$0xff] (!%p1609_p12), %v2266_v4  ;;  %380 = vst [vmem:[#allocation2 + $0x78] sm:$0xff] (!%p1609_p12), %v2266_v4 }
  0x2f   : > { %382 = vst.msk [vmem:[#allocation3] sm:$0xff] %vm381_vm0, %v2266_v4  ;;  %383 = vst.msk [vmem:[#allocation3 + $0x8] sm:$0xff] %vm381_vm0, %v2266_v4 }
  0x30   : > { %384 = vst.msk [vmem:[#allocation3 + $0x10] sm:$0xff] %vm381_vm0, %v2266_v4  ;;  %385 = vst.msk [vmem:[#allocation3 + $0x18] sm:$0xff] %vm381_vm0, %v2266_v4 }
  0x31   : > { %386 = vst.msk [vmem:[#allocation3 + $0x20] sm:$0xff] %vm381_vm0, %v2266_v4  ;;  %387 = vst.msk [vmem:[#allocation3 + $0x28] sm:$0xff] %vm381_vm0, %v2266_v4 }
  0x32   : > { %388 = vst.msk [vmem:[#allocation3 + $0x30] sm:$0xff] %vm381_vm0, %v2266_v4  ;;  %389 = vst.msk [vmem:[#allocation3 + $0x38] sm:$0xff] %vm381_vm0, %v2266_v4 }
  0x33   : > { %390 = vst.msk [vmem:[#allocation3 + $0x40] sm:$0xff] %vm381_vm0, %v2266_v4  ;;  %391 = vst.msk [vmem:[#allocation3 + $0x48] sm:$0xff] %vm381_vm0, %v2266_v4 }
  0x34   : > { %392 = vst.msk [vmem:[#allocation3 + $0x50] sm:$0xff] %vm381_vm0, %v2266_v4  ;;  %393 = vst.msk [vmem:[#allocation3 + $0x58] sm:$0xff] %vm381_vm0, %v2266_v4 }
  0x35   : > { %394 = vst.msk [vmem:[#allocation3 + $0x60] sm:$0xff] %vm381_vm0, %v2266_v4  ;;  %395 = vst.msk [vmem:[#allocation3 + $0x68] sm:$0xff] %vm381_vm0, %v2266_v4 }
  0x36   : > { %396 = vst.msk [vmem:[#allocation3 + $0x70] sm:$0xff] %vm381_vm0, %v2266_v4  ;;  %397 = vst.msk [vmem:[#allocation3 + $0x78] sm:$0xff] %vm381_vm0, %v2266_v4 }
  0x37 PF: > { %v450_v5 = vld [vmem:[%s2371_s13] sm:$0xff]  ;;  %v451_v6 = vld [vmem:[%s2371_s13 + $0x8] sm:$0xff]  ;;  %v452_v7 = vld [vmem:[%s2371_s13 + $0x10] sm:$0xff]  ;;  %vm707_vm1 = vcmask 7168   ;;  %p1610_p13 = scmp.ne.s32.totalorder %s2248_s23, 1 }
  0x38   : > { %v1958_v8 = vpack.c.bf16 %v451_v6, %v450_v5  ;;  %v453_v9 = vld [vmem:[%s2371_s13 + $0x18] sm:$0xff]  ;;  %v454_v11 = vld [vmem:[%s2371_s13 + $0x20] sm:$0xff]  ;;  %v455_v12 = vld [vmem:[%s2371_s13 + $0x28] sm:$0xff] }
  0x39   : > { %v1962_v10 = vpack.c.bf16 %v453_v9, %v452_v7  ;;  %v1966_v13 = vpack.c.bf16 %v455_v12, %v454_v11  ;;  %v398_v14 = vld [vmem:[%s2383_s24] sm:$0xff]  ;;  %v2410_v15 = vld [vmem:[%s2383_s24 + $0x10] sm:$0xff]  ;;  %v457_v17 = vld [vmem:[%s2371_s13 + $0x38] sm:$0xff] }
  0x3a   : > { %1959 = vmatprep.subr.bf16.mxu0 %v1958_v8  ;;  %2070 = vmatprep.subr.bf16.mxu1 %v1958_v8  ;;  %v456_v16 = vld [vmem:[%s2371_s13 + $0x30] sm:$0xff]  ;;  %v402_v18 = vunpack.c.0.s8 %v398_v14  ;;  %v410_v19 = vunpack.c.0.s8 %v2410_v15  ;;  %v404_v20 = vunpack.c.2.s8 %v398_v14  ;;  %v458_v24 = vld [vmem:[%s2371_s13 + $0x40] sm:$0xff]  ;;  %v459_v25 = vld [vmem:[%s2371_s13 + $0x48] sm:$0xff]  ;;  %v403_v26 = vunpack.c.1.s8 %v398_v14 }
  0x3b   : > { %1961 = vmatpush3.bf16.msra.mxu0 %v1958_v8  ;;  %2078 = vmatpush3.bf16.msra.mxu1 %v1958_v8  ;;  %v1970_v23 = vpack.c.bf16 %v457_v17, %v456_v16  ;;  %v405_v28 = vunpack.c.3.s8 %v398_v14  ;;  %v399_v29 = vld [vmem:[%s2383_s24 + $0x8] sm:$0xff]  ;;  %v1974_v30 = vpack.c.bf16 %v459_v25, %v458_v24  ;;  %v460_v31 = vld [vmem:[%s2371_s13 + $0x50] sm:$0xff]  ;;  %v461_v32 = vld [vmem:[%s2371_s13 + $0x58] sm:$0xff]  ;;  %v411_v45 = vunpack.c.1.s8 %v2410_v15 }
  0x3c   : > { %1963 = vmatprep.subr.bf16.mxu0 %v1962_v10  ;;  %2071 = vmatprep.subr.bf16.mxu1 %v1962_v10  ;;  %v418_v21 = vcvt.s32.f32 %v402_v18  ;;  %v426_v22 = vcvt.s32.f32 %v410_v19  ;;  %v2417_v27 = vcvt.s32.f32 %v404_v20  ;;  %v419_v33 = vcvt.s32.f32 %v403_v26  ;;  %v462_v42 = vld [vmem:[%s2371_s13 + $0x60] sm:$0xff]  ;;  %v463_v43 = vld [vmem:[%s2371_s13 + $0x68] sm:$0xff]  ;;  %v464_v48 = vld [vmem:[%s2371_s13 + $0x70] sm:$0xff] }
  0x3d   : > { %v421_v34 = vcvt.s32.f32 %v405_v28  ;;  %v406_v35 = vunpack.c.0.s8 %v399_v29  ;;  %v407_v36 = vunpack.c.1.s8 %v399_v29  ;;  %v1978_v37 = vpack.c.bf16 %v461_v32, %v460_v31  ;;  %v465_v49 = vld [vmem:[%s2371_s13 + $0x78] sm:$0xff]  ;;  %v645_v1 = vld [vmem:[#allocation3 + $0x10] sm:$0xff]  ;;  %v643_v2 = vld [vmem:[#allocation3] sm:$0xff] }
  0x3e   : > { %1782 = vmatprep.mubr.f32.mxu0 %v418_v21  ;;  %1794 = vmatprep.mubr.f32.mxu1 %v426_v22  ;;  %v408_v40 = vunpack.c.2.s8 %v399_v29  ;;  %v409_v41 = vunpack.c.3.s8 %v399_v29  ;;  %v1982_v44 = vpack.c.bf16 %v463_v43, %v462_v42  ;;  %v1986_v50 = vpack.c.bf16 %v465_v49, %v464_v48  ;;  %v401_v54 = vld [vmem:[%s2383_s24 + $0x18] sm:$0xff]  ;;  %v644_v8 = vld [vmem:[#allocation3 + $0x8] sm:$0xff]  ;;  %v647_v14 = vld [vmem:[#allocation3 + $0x20] sm:$0xff] }
  0x3f   : > { %1965 = vmatpush3.bf16.msra.mxu0 %v1962_v10  ;;  %2079 = vmatpush3.bf16.msra.mxu1 %v1962_v10  ;;  %v422_v38 = vcvt.s32.f32 %v406_v35  ;;  %v423_v39 = vcvt.s32.f32 %v407_v36  ;;  %v427_v51 = vcvt.s32.f32 %v411_v45  ;;  %v412_v52 = vunpack.c.2.s8 %v2410_v15  ;;  %v646_v7 = vld [vmem:[#allocation3 + $0x18] sm:$0xff]  ;;  %v649_v20 = vld [vmem:[#allocation3 + $0x30] sm:$0xff]  ;;  %v652_v25 = vld [vmem:[#allocation3 + $0x48] sm:$0xff] }
  0x40   : > { %1967 = vmatprep.subr.bf16.mxu0 %v1966_v13  ;;  %2072 = vmatprep.subr.bf16.mxu1 %v1966_v13  ;;  %v424_v46 = vcvt.s32.f32 %v408_v40  ;;  %v425_v47 = vcvt.s32.f32 %v409_v41  ;;  %v413_v53 = vunpack.c.3.s8 %v2410_v15  ;;  %v414_v57 = vunpack.c.0.s8 %v401_v54  ;;  %v650_v19 = vld [vmem:[#allocation3 + $0x38] sm:$0xff]  ;;  %v651_v26 = vld [vmem:[#allocation3 + $0x40] sm:$0xff]  ;;  %v653_v32 = vld [vmem:[#allocation3 + $0x50] sm:$0xff] }
  0x41   : > { %663 = vadd.xlane.f32.xlu1 %v2417_v27  ;;  %659 = vadd.xlane.f32.xlu0 %v418_v21  ;;  %v428_v55 = vcvt.s32.f32 %v412_v52  ;;  %v415_v58 = vunpack.c.1.s8 %v401_v54  ;;  %v416_v61 = vunpack.c.2.s8 %v401_v54  ;;  %v417_v62 = vunpack.c.3.s8 %v401_v54  ;;  %v654_v31 = vld [vmem:[#allocation3 + $0x58] sm:$0xff]  ;;  %v435_v49 = vld [vmem:[#allocation2 + $0x8] sm:$0xff]  ;;  %v434_v52 = vld [vmem:[#allocation2] sm:$0xff] }
  0x42   : > { %v429_v56 = vcvt.s32.f32 %v413_v53  ;;  %v430_v59 = vcvt.s32.f32 %v414_v57  ;;  %v658_v43 = vld [vmem:[#allocation3 + $0x78] sm:$0xff] }
  0x43   : > { %1969 = vmatpush3.bf16.msra.mxu0 %v1966_v13  ;;  %2080 = vmatpush3.bf16.msra.mxu1 %v1966_v13  ;;  %v431_v60 = vcvt.s32.f32 %v415_v58  ;;  %v432_v63 = vcvt.s32.f32 %v416_v61  ;;  %v433_v0 = vcvt.s32.f32 %v417_v62  ;;  %v648_v13 = vld [vmem:[#allocation3 + $0x28] sm:$0xff]  ;;  %v437_v61 = vld [vmem:[#allocation2 + $0x18] sm:$0xff] }
  0x44   : > { %1971 = vmatprep.subr.bf16.mxu0 %v1970_v23  ;;  %2073 = vmatprep.subr.bf16.mxu1 %v1970_v23  ;;  %v445_v62 = vld [vmem:[#allocation2 + $0x58] sm:$0xff] }
  0x45   : > { %665 = vadd.xlane.f32.xlu1 %v421_v34  ;;  %661 = vadd.xlane.f32.xlu0 %v419_v33 }
  0x47   : > { %1973 = vmatpush3.bf16.msra.mxu0 %v1970_v23  ;;  %2081 = vmatpush3.bf16.msra.mxu1 %v1970_v23 }
  0x48   : > { %1975 = vmatprep.subr.bf16.mxu0 %v1974_v30  ;;  %2074 = vmatprep.subr.bf16.mxu1 %v1974_v30 }
  0x49   : > { %669 = vadd.xlane.f32.xlu1 %v423_v39  ;;  %667 = vadd.xlane.f32.xlu0 %v422_v38 }
  0x4b   : > { %1977 = vmatpush3.bf16.msra.mxu0 %v1974_v30  ;;  %2082 = vmatpush3.bf16.msra.mxu1 %v1974_v30 }
  0x4c   : > { %1979 = vmatprep.subr.bf16.mxu0 %v1978_v37  ;;  %2075 = vmatprep.subr.bf16.mxu1 %v1978_v37 }
  0x4d   : > { %673 = vadd.xlane.f32.xlu1 %v425_v47  ;;  %671 = vadd.xlane.f32.xlu0 %v424_v46 }
  0x4f   : > { %1981 = vmatpush3.bf16.msra.mxu0 %v1978_v37  ;;  %2083 = vmatpush3.bf16.msra.mxu1 %v1978_v37  ;;  %v656_v37 = vld [vmem:[#allocation3 + $0x68] sm:$0xff] }
  0x50   : > { %1983 = vmatprep.subr.bf16.mxu0 %v1982_v44  ;;  %2076 = vmatprep.subr.bf16.mxu1 %v1982_v44 }
  0x51   : > { %677 = vadd.xlane.f32.xlu1 %v427_v51  ;;  %675 = vadd.xlane.f32.xlu0 %v426_v22 }
  0x53   : > { %1985 = vmatpush3.bf16.msra.mxu0 %v1982_v44  ;;  %2084 = vmatpush3.bf16.msra.mxu1 %v1982_v44  ;;  %v657_v44 = vld [vmem:[#allocation3 + $0x70] sm:$0xff] }
  0x54   : > { %1987 = vmatprep.subr.bf16.mxu0 %v1986_v50  ;;  %2077 = vmatprep.subr.bf16.mxu1 %v1986_v50 }
  0x55   : > { %681 = vadd.xlane.f32.xlu1 %v429_v56  ;;  %679 = vadd.xlane.f32.xlu0 %v428_v55 }
  0x57   : > { %1989 = vmatpush3.bf16.msra.mxu0 %v1986_v50  ;;  %2085 = vmatpush3.bf16.msra.mxu1 %v1986_v50  ;;  %v443_v50 = vld [vmem:[#allocation2 + $0x48] sm:$0xff] }
  0x59   : > { %685 = vadd.xlane.f32.xlu1 %v431_v60  ;;  %683 = vadd.xlane.f32.xlu0 %v430_v59 }
  0x5a   : > { %1783 = vmatmul.mubr.f32.vlgmr.msra.gmra.mrb[0].mxu0 %v419_v33  ;;  %1795 = vmatmul.mubr.f32.vlgmr.msra.gmra.mrb[0].mxu1 %v427_v51  ;;  %v442_v51 = vld [vmem:[#allocation2 + $0x40] sm:$0xff] }
  0x5b   : > { %1785 = vmatprep.mubr.f32.mxu0 %v2417_v27  ;;  %1797 = vmatprep.mubr.f32.mxu1 %v428_v55 }
  0x5d   : > { %689 = vadd.xlane.f32.xlu1 %v433_v0  ;;  %687 = vadd.xlane.f32.xlu0 %v432_v63 }
  0x5e   : > { %1786 = vmatmul.mubr.f32.gmra.mrb[2].mxu0 %v421_v34  ;;  %1798 = vmatmul.mubr.f32.gmra.mrb[2].mxu1 %v429_v56 }
  0x5f   : > { %1788 = vmatprep.mubr.f32.mxu0 %v422_v38  ;;  %1800 = vmatprep.mubr.f32.mxu1 %v430_v59  ;;  %v655_v38 = vld [vmem:[#allocation3 + $0x60] sm:$0xff] }
  0x62   : > { %1789 = vmatmul.mubr.f32.gmra.mrb[4].mxu0 %v423_v39  ;;  %1801 = vmatmul.mubr.f32.gmra.mrb[4].mxu1 %v431_v60 }
  0x63   : > { %1791 = vmatprep.mubr.f32.mxu0 %v424_v46  ;;  %1803 = vmatprep.mubr.f32.mxu1 %v432_v63  ;;  %v444_v63 = vld [vmem:[#allocation2 + $0x50] sm:$0xff] }
  0x66   : > { %1792 = vmatmul.mubr.f32.gmra.mrb[6].mxu0 %v425_v47  ;;  %1804 = vmatmul.mubr.f32.gmra.mrb[6].mxu1 %v433_v0  ;;  %v436_v0 = vld [vmem:[#allocation2 + $0x10] sm:$0xff] }
  0xce   : > { %v664_v3 = vpop.xlane.xlu1 %663  ;;  %v660_v4 = vpop.xlane.xlu0 %659 }
  0xcf   : > { %v693_v5 = vadd.f32 %v664_v3, %v645_v1  ;;  %v691_v6 = vadd.f32 %v660_v4, %v643_v2 }
  0xd1   : > { %710 = vst.msk [vmem:[#allocation3 + $0x10] sm:$0xff] %vm707_vm1, %v693_v5  ;;  %708 = vst.msk [vmem:[#allocation3] sm:$0xff] %vm707_vm1, %v691_v6 }
  0xd2   : > { %v666_v9 = vpop.xlane.xlu1 %665  ;;  %v662_v10 = vpop.xlane.xlu0 %661 }
  0xd3   : > { %v694_v11 = vadd.f32 %v666_v9, %v646_v7  ;;  %v692_v12 = vadd.f32 %v662_v10, %v644_v8  ;;  %v439_v9 = vld [vmem:[#allocation2 + $0x28] sm:$0xff] }
  0xd4   : > { %v447_v10 = vld [vmem:[#allocation2 + $0x68] sm:$0xff] }
  0xd5   : > { %711 = vst.msk [vmem:[#allocation3 + $0x18] sm:$0xff] %vm707_vm1, %v694_v11  ;;  %709 = vst.msk [vmem:[#allocation3 + $0x8] sm:$0xff] %vm707_vm1, %v692_v12  ;;  %v446_v11 = vld [vmem:[#allocation2 + $0x60] sm:$0xff] }
  0xd6   : > { %v670_v15 = vpop.xlane.xlu1 %669  ;;  %v668_v16 = vpop.xlane.xlu0 %667  ;;  %v438_v12 = vld [vmem:[#allocation2 + $0x20] sm:$0xff] }
  0xd7   : > { %v696_v17 = vadd.f32 %v670_v15, %v648_v13  ;;  %v695_v18 = vadd.f32 %v668_v16, %v647_v14 }
  0xd9   : > { %713 = vst.msk [vmem:[#allocation3 + $0x28] sm:$0xff] %vm707_vm1, %v696_v17  ;;  %712 = vst.msk [vmem:[#allocation3 + $0x20] sm:$0xff] %vm707_vm1, %v695_v18 }
  0xda   : > { %v674_v21 = vpop.xlane.xlu1 %673  ;;  %v672_v22 = vpop.xlane.xlu0 %671 }
  0xdb   : > { %v698_v23 = vadd.f32 %v674_v21, %v650_v19  ;;  %v697_v24 = vadd.f32 %v672_v22, %v649_v20  ;;  %v441_v21 = vld [vmem:[#allocation2 + $0x38] sm:$0xff] }
  0xdc   : > { %v449_v22 = vld [vmem:[#allocation2 + $0x78] sm:$0xff] }
  0xdd   : > { %715 = vst.msk [vmem:[#allocation3 + $0x38] sm:$0xff] %vm707_vm1, %v698_v23  ;;  %714 = vst.msk [vmem:[#allocation3 + $0x30] sm:$0xff] %vm707_vm1, %v697_v24  ;;  %v448_v23 = vld [vmem:[#allocation2 + $0x70] sm:$0xff] }
  0xde   : > { %v678_v27 = vpop.xlane.xlu1 %677  ;;  %v676_v28 = vpop.xlane.xlu0 %675  ;;  %v440_v24 = vld [vmem:[#allocation2 + $0x30] sm:$0xff] }
  0xdf   : > { %v700_v29 = vadd.f32 %v678_v27, %v652_v25  ;;  %v699_v30 = vadd.f32 %v676_v28, %v651_v26 }
  0xe1   : > { %717 = vst.msk [vmem:[#allocation3 + $0x48] sm:$0xff] %vm707_vm1, %v700_v29  ;;  %716 = vst.msk [vmem:[#allocation3 + $0x40] sm:$0xff] %vm707_vm1, %v699_v30 }
  0xe2   : > { %v682_v33 = vpop.xlane.xlu1 %681  ;;  %v680_v34 = vpop.xlane.xlu0 %679 }
  0xe3   : > { %v702_v35 = vadd.f32 %v682_v33, %v654_v31  ;;  %v701_v36 = vadd.f32 %v680_v34, %v653_v32  ;;  %v730_v33 = vld [vmem:[#allocation3 + $0x10] sm:$0xff] (!%p1610_p13)  ;;  %v728_v34 = vld [vmem:[#allocation3] sm:$0xff] (!%p1610_p13) }
  0xe4   : > { %2178 = vrcp.f32 (!%p1610_p13), %v730_v33  ;;  %vm746_vm2 = vcmp.gt.f32.partialorder (!%p1610_p13), %v730_v33, 0.0  ;;  %vm744_vm3 = vcmp.gt.f32.partialorder (!%p1610_p13), %v728_v34, 0.0 }
  0xe5   : > { %719 = vst.msk [vmem:[#allocation3 + $0x58] sm:$0xff] %vm707_vm1, %v702_v35  ;;  %718 = vst.msk [vmem:[#allocation3 + $0x50] sm:$0xff] %vm707_vm1, %v701_v36  ;;  %v731_v35 = vld [vmem:[#allocation3 + $0x18] sm:$0xff] (!%p1610_p13)  ;;  %v2267_v36 = vmov (!%p1610_p13), 0   ;;  %2180 = vrcp.f32 (!%p1610_p13), %v728_v34 }
  0xe6   : > { %v686_v39 = vpop.xlane.xlu1 %685  ;;  %v684_v40 = vpop.xlane.xlu0 %683  ;;  %2177 = vset.pattern.permute.xlu1 (!%p1610_p13), %v2267_v36  ;;  %2176 = vset.pattern.permute.xlu0 (!%p1610_p13), %v2267_v36  ;;  %2182 = vrcp.f32 (!%p1610_p13), %v731_v35  ;;  %vm747_vm4 = vcmp.gt.f32.partialorder (!%p1610_p13), %v731_v35, 0.0  ;;  %v964_v35 = vld [vmem:[%s2758_s4 + $0x60] sm:$0xff] (!%p1610_p13)  ;;  %v965_v36 = vld [vmem:[%s2758_s4 + $0x68] sm:$0xff] (!%p1610_p13) }
  0xe7   : > { %v704_v41 = vadd.f32 %v686_v39, %v656_v37  ;;  %v703_v42 = vadd.f32 %v684_v40, %v655_v38  ;;  %v729_v37 = vld [vmem:[#allocation3 + $0x8] sm:$0xff] (!%p1610_p13)  ;;  %v2451_v39 = vld [vmem:[#allocation3 + $0x20] sm:$0xff] (!%p1610_p13) }
  0xe8   : > { %v2449_v38 = vld [vmem:[#allocation3 + $0x28] sm:$0xff] (!%p1610_p13)  ;;  %2184 = vrcp.f32 (!%p1610_p13), %v729_v37  ;;  %v952_v40 = vld [vmem:[%s2758_s4] sm:$0xff] (!%p1610_p13)  ;;  %vm745_vm5 = vcmp.gt.f32.partialorder (!%p1610_p13), %v729_v37, 0.0  ;;  %vm748_vm7 = vcmp.gt.f32.partialorder (!%p1610_p13), %v2451_v39, 0.0 }
  0xe9   : > { %721 = vst.msk [vmem:[#allocation3 + $0x68] sm:$0xff] %vm707_vm1, %v704_v41  ;;  %720 = vst.msk [vmem:[#allocation3 + $0x60] sm:$0xff] %vm707_vm1, %v703_v42  ;;  %2186 = vrcp.f32 (!%p1610_p13), %v2449_v38  ;;  %v953_v41 = vld [vmem:[%s2758_s4 + $0x8] sm:$0xff] (!%p1610_p13)  ;;  %v2461_v42 = vld [vmem:[#allocation3 + $0x38] sm:$0xff] (!%p1610_p13)  ;;  %vm749_vm6 = vcmp.gt.f32.partialorder (!%p1610_p13), %v2449_v38, 0.0 }
  0xea   : > { %v690_v45 = vpop.xlane.xlu1 %689  ;;  %v688_v46 = vpop.xlane.xlu0 %687  ;;  %2188 = vrcp.f32 (!%p1610_p13), %v2451_v39  ;;  %vm751_vm8 = vcmp.gt.f32.partialorder (!%p1610_p13), %v2461_v42, 0.0  ;;  %v946_v39 = vld [vmem:[%s2757_s3 + $0x50] sm:$0xff] (!%p1610_p13) }
  0xeb   : > { %v706_v47 = vadd.f32 %v690_v45, %v658_v43  ;;  %v705_v48 = vadd.f32 %v688_v46, %v657_v44  ;;  %v1990_v43 = vpack.c.bf16 (!%p1610_p13), %v953_v41, %v952_v40  ;;  %v954_v44 = vld [vmem:[%s2758_s4 + $0x10] sm:$0xff] (!%p1610_p13)  ;;  %v955_v45 = vld [vmem:[%s2758_s4 + $0x18] sm:$0xff] (!%p1610_p13)  ;;  %2190 = vrcp.f32 (!%p1610_p13), %v2461_v42 }
  0xec   : > { %v2469_v46 = vld [vmem:[#allocation3 + $0x30] sm:$0xff] (!%p1610_p13)  ;;  %v947_v40 = vld [vmem:[%s2757_s3 + $0x58] sm:$0xff] (!%p1610_p13)  ;;  %v2014_v42 = vpack.c.bf16 (!%p1610_p13), %v965_v36, %v964_v35 }
  0xed   : > { %723 = vst.msk [vmem:[#allocation3 + $0x78] sm:$0xff] %vm707_vm1, %v706_v47  ;;  %722 = vst.msk [vmem:[#allocation3 + $0x70] sm:$0xff] %vm707_vm1, %v705_v48  ;;  %v1994_v47 = vpack.c.bf16 (!%p1610_p13), %v955_v45, %v954_v44  ;;  %v956_v48 = vld [vmem:[%s2758_s4 + $0x20] sm:$0xff] (!%p1610_p13)  ;;  %1991 = vmatprep.subr.bf16.mxu0 (!%p1610_p13), %v1990_v43  ;;  %2192 = vrcp.f32 (!%p1610_p13), %v2469_v46  ;;  %vm750_vm9 = vcmp.gt.f32.partialorder (!%p1610_p13), %v2469_v46, 0.0  ;;  %v966_v45 = vld [vmem:[%s2758_s4 + $0x70] sm:$0xff] (!%p1610_p13) }
  0xee   : > { %1993 = vmatpush3.bf16.msra.mxu0 (!%p1610_p13), %v1990_v43  ;;  %v967_v46 = vld [vmem:[%s2758_s4 + $0x78] sm:$0xff] (!%p1610_p13) }
  0xef   : > { %1995 = vmatprep.subr.bf16.mxu0 (!%p1610_p13), %v1994_v47 }
  0xf2   : > { %1997 = vmatpush3.bf16.msra.mxu0 (!%p1610_p13), %v1994_v47 }
  0xf4   : > { %v2569_v34 = vld [vmem:[#allocation3 + $0x70] sm:$0xff] (!%p1610_p13) }
  0xf5   : > { %vm758_vm1 = vcmp.gt.f32.partialorder (!%p1610_p13), %v2569_v34, 0.0 }
 0x12d   : > { %v1784_v53 = vpop.f32.mrb[0].mxu0  ;;  %v1796_v54 = vpop.f32.mrb[0].mxu1 }
 0x12e   : > { %v612_v55 = vadd.f32 %v1784_v53, %v435_v49  ;;  %v620_v56 = vadd.f32 %v1796_v54, %v443_v50  ;;  %v572_v57 = vpop.f32.mrb[1].mxu1  ;;  %v532_v58 = vpop.f32.mrb[1].mxu0  ;;  %v957_v49 = vld [vmem:[%s2758_s4 + $0x28] sm:$0xff] (!%p1610_p13)  ;;  %v936_v50 = vld [vmem:[%s2757_s3] sm:$0xff] (!%p1610_p13) }
 0x12f   : > { %v619_v59 = vadd.f32 %v572_v57, %v442_v51  ;;  %v611_v60 = vadd.f32 %v532_v58, %v434_v52  ;;  %v937_v51 = vld [vmem:[%s2757_s3 + $0x8] sm:$0xff] (!%p1610_p13)  ;;  %v1998_v53 = vpack.c.bf16 (!%p1610_p13), %v957_v49, %v956_v48  ;;  %v2179_v57 = vpop.eup (!%p1610_p13), %2178  ;;  %v2495_v58 = vld [vmem:[#allocation3 + $0x40] sm:$0xff] (!%p1610_p13)  ;;  %v2600_v48 = vpack.c.bf16 (!%p1610_p13), %v947_v40, %v946_v39 }
 0x130   : > { %628 = vst [vmem:[#allocation2 + $0x8] sm:$0xff] %v612_v55  ;;  %636 = vst [vmem:[#allocation2 + $0x48] sm:$0xff] %v620_v56  ;;  %v2485_v52 = vld [vmem:[#allocation3 + $0x48] sm:$0xff] (!%p1610_p13)  ;;  %v2487_v54 = vpack.c.bf16 (!%p1610_p13), %v937_v51, %v936_v50  ;;  %v938_v55 = vld [vmem:[%s2757_s3 + $0x10] sm:$0xff] (!%p1610_p13)  ;;  %vm752_vm11 = vcmp.gt.f32.partialorder (!%p1610_p13), %v2495_v58, 0.0 }
 0x131   : > { %635 = vst [vmem:[#allocation2 + $0x40] sm:$0xff] %v619_v59  ;;  %627 = vst [vmem:[#allocation2] sm:$0xff] %v611_v60  ;;  %v1787_v1 = vpop.f32.mrb[2].mxu0  ;;  %v1799_v2 = vpop.f32.mrb[2].mxu1  ;;  %v939_v56 = vld [vmem:[%s2757_s3 + $0x18] sm:$0xff] (!%p1610_p13)  ;;  %v958_v59 = vld [vmem:[%s2758_s4 + $0x30] sm:$0xff] (!%p1610_p13)  ;;  %2194 = vrcp.f32 (!%p1610_p13), %v2485_v52  ;;  %1999 = vmatprep.subr.bf16.mxu0 (!%p1610_p13), %v1998_v53 }
 0x132   : > { %v614_v3 = vadd.f32 %v1787_v1, %v437_v61  ;;  %v622_v4 = vadd.f32 %v1799_v2, %v445_v62  ;;  %v582_v5 = vpop.f32.mrb[3].mxu1  ;;  %v542_v6 = vpop.f32.mrb[3].mxu0  ;;  %v959_v60 = vld [vmem:[%s2758_s4 + $0x38] sm:$0xff] (!%p1610_p13)  ;;  %v794_v62 = vsel (!%p1610_p13), %vm746_vm2, %v2179_v57, 0.0  ;;  %2086 = vmatprep.subr.bf16.mxu1 (!%p1610_p13), %v2487_v54  ;;  %v940_v2 = vld [vmem:[%s2757_s3 + $0x20] sm:$0xff] (!%p1610_p13)  ;;  %2196 = vrcp.f32 (!%p1610_p13), %v2495_v58  ;;  %2001 = vmatpush3.bf16.msra.mxu0 (!%p1610_p13), %v1998_v53  ;;  %v949_v50 = vld [vmem:[%s2757_s3 + $0x68] sm:$0xff] (!%p1610_p13) }
 0x133   : > { %v621_v7 = vadd.f32 %v582_v5, %v444_v63  ;;  %v613_v8 = vadd.f32 %v542_v6, %v436_v0  ;;  %v2181_v61 = vpop.eup (!%p1610_p13), %2180  ;;  %v2505_v63 = vpack.c.bf16 (!%p1610_p13), %v939_v56, %v938_v55  ;;  %836 = vperm.xlu1 (!%p1610_p13), %2177, %v794_v62   ;;  %v2517_v6 = vld [vmem:[#allocation3 + $0x58] sm:$0xff] (!%p1610_p13)  ;;  %2094 = vmatpush3.bf16.msra.mxu1 (!%p1610_p13), %v2487_v54  ;;  %vm753_vm10 = vcmp.gt.f32.partialorder (!%p1610_p13), %v2485_v52, 0.0  ;;  %v948_v49 = vld [vmem:[%s2757_s3 + $0x60] sm:$0xff] (!%p1610_p13)  ;;  %v950_v58 = vld [vmem:[%s2757_s3 + $0x70] sm:$0xff] (!%p1610_p13) }
 0x134   : > { %630 = vst [vmem:[#allocation2 + $0x18] sm:$0xff] %v614_v3  ;;  %638 = vst [vmem:[#allocation2 + $0x58] sm:$0xff] %v622_v4  ;;  %v2183_v0 = vpop.eup (!%p1610_p13), %2182  ;;  %v792_v1 = vsel (!%p1610_p13), %vm744_vm3, %v2181_v61, 0.0  ;;  %v941_v3 = vld [vmem:[%s2757_s3 + $0x28] sm:$0xff] (!%p1610_p13)  ;;  %2198 = vrcp.f32 (!%p1610_p13), %v2517_v6  ;;  %vm755_vm12 = vcmp.gt.f32.partialorder (!%p1610_p13), %v2517_v6, 0.0  ;;  %v2018_v52 = vpack.c.bf16 (!%p1610_p13), %v967_v46, %v966_v45  ;;  %v928_v61 = vld [vmem:[%s2376_s17 + $0x40] sm:$0xff] (!%p1610_p13) }
 0x135   : > { %637 = vst [vmem:[#allocation2 + $0x50] sm:$0xff] %v621_v7  ;;  %629 = vst [vmem:[#allocation2 + $0x10] sm:$0xff] %v613_v8  ;;  %v1790_v13 = vpop.f32.mrb[4].mxu0  ;;  %v1802_v14 = vpop.f32.mrb[4].mxu1  ;;  %826 = vperm.xlu0 (!%p1610_p13), %2176, %v792_v1   ;;  %v795_v5 = vsel (!%p1610_p13), %vm747_vm4, %v2183_v0, 0.0  ;;  %v2002_v7 = vpack.c.bf16 (!%p1610_p13), %v959_v60, %v958_v59  ;;  %2087 = vmatprep.subr.bf16.mxu1 (!%p1610_p13), %v2505_v63  ;;  %v2612_v57 = vpack.c.bf16 (!%p1610_p13), %v949_v50, %v948_v49  ;;  %v951_v59 = vld [vmem:[%s2757_s3 + $0x78] sm:$0xff] (!%p1610_p13) }
 0x136   : > { %v616_v15 = vadd.f32 %v1790_v13, %v439_v9  ;;  %v624_v16 = vadd.f32 %v1802_v14, %v447_v10  ;;  %v592_v17 = vpop.f32.mrb[5].mxu1  ;;  %v552_v18 = vpop.f32.mrb[5].mxu0  ;;  %v2521_v10 = vld [vmem:[#allocation3 + $0x50] sm:$0xff] (!%p1610_p13)  ;;  %v2532_v14 = vpack.c.bf16 (!%p1610_p13), %v941_v3, %v940_v2  ;;  %1906 = vmatprep.mubr.f32.mxu1 (!%p1610_p13), %v928_v61  ;;  %v2625_v2 = vpack.c.bf16 (!%p1610_p13), %v951_v59, %v950_v58  ;;  %v921_v61 = vld [vmem:[%s2376_s17 + $0x8] sm:$0xff] (!%p1610_p13) }
 0x137   : > { %v623_v19 = vadd.f32 %v592_v17, %v446_v11  ;;  %v615_v20 = vadd.f32 %v552_v18, %v438_v12  ;;  %727 = sbr.rel (%p1610_p13) target bundleno = 933 (0x3a5), region = 90  ;;  %v2185_v4 = vpop.eup (!%p1610_p13), %2184  ;;  %v960_v11 = vld [vmem:[%s2758_s4 + $0x40] sm:$0xff] (!%p1610_p13)  ;;  %v961_v12 = vld [vmem:[%s2758_s4 + $0x48] sm:$0xff] (!%p1610_p13)  ;;  %841 = vperm.xlu1 (!%p1610_p13), %2177, %v795_v5   ;;  %2200 = vrcp.f32 (!%p1610_p13), %v2521_v10  ;;  %2003 = vmatprep.subr.bf16.mxu0 (!%p1610_p13), %v2002_v7  ;;  %vm754_vm13 = vcmp.gt.f32.partialorder (!%p1610_p13), %v2521_v10, 0.0  ;;  %v930_v6 = vld [vmem:[%s2376_s17 + $0x50] sm:$0xff] (!%p1610_p13) }
 0x138   : > { %632 = vst [vmem:[#allocation2 + $0x28] sm:$0xff] %v616_v15  ;;  %640 = vst [vmem:[#allocation2 + $0x68] sm:$0xff] %v624_v16  ;;  %v2187_v8 = vpop.eup (!%p1610_p13), %2186  ;;  %v793_v9 = vsel (!%p1610_p13), %vm745_vm5, %v2185_v4, 0.0  ;;  %v942_v15 = vld [vmem:[%s2757_s3 + $0x30] sm:$0xff] (!%p1610_p13)  ;;  %v943_v16 = vld [vmem:[%s2757_s3 + $0x38] sm:$0xff] (!%p1610_p13)  ;;  %2095 = vmatpush3.bf16.msra.mxu1 (!%p1610_p13), %v2505_v63  ;;  %2005 = vmatpush3.bf16.msra.mxu0 (!%p1610_p13), %v2002_v7  ;;  %vm1282_vm2 = vcmask (!%p1610_p13), 523264  }
 0x139   : > { %639 = vst [vmem:[#allocation2 + $0x60] sm:$0xff] %v623_v19  ;;  %631 = vst [vmem:[#allocation2 + $0x20] sm:$0xff] %v615_v20  ;;  %v1793_v25 = vpop.f32.mrb[6].mxu0  ;;  %v1805_v26 = vpop.f32.mrb[6].mxu1  ;;  %831 = vperm.xlu0 (!%p1610_p13), %2176, %v793_v9   ;;  %v797_v17 = vsel (!%p1610_p13), %vm749_vm6, %v2187_v8, 0.0  ;;  %v2542_v18 = vld [vmem:[#allocation3 + $0x68] sm:$0xff] (!%p1610_p13)  ;;  %v2006_v19 = vpack.c.bf16 (!%p1610_p13), %v961_v12, %v960_v11  ;;  %2088 = vmatprep.subr.bf16.mxu1 (!%p1610_p13), %v2532_v14 }
 0x13a   : > { %v618_v27 = vadd.f32 %v1793_v25, %v441_v21  ;;  %v626_v28 = vadd.f32 %v1805_v26, %v449_v22  ;;  %v602_v29 = vpop.f32.mrb[7].mxu1  ;;  %v562_v30 = vpop.f32.mrb[7].mxu0  ;;  %v2545_v22 = vld [vmem:[#allocation3 + $0x60] sm:$0xff] (!%p1610_p13)  ;;  %v2556_v26 = vpack.c.bf16 (!%p1610_p13), %v943_v16, %v942_v15  ;;  %2202 = vrcp.f32 (!%p1610_p13), %v2542_v18  ;;  %v929_v5 = vld [vmem:[%s2376_s17 + $0x48] sm:$0xff] (!%p1610_p13)  ;;  %v931_v7 = vld [vmem:[%s2376_s17 + $0x58] sm:$0xff] (!%p1610_p13) }
 0x13b   : > { %v625_v31 = vadd.f32 %v602_v29, %v448_v23  ;;  %v617_v32 = vadd.f32 %v562_v30, %v440_v24  ;;  %v2189_v13 = vpop.eup (!%p1610_p13), %2188  ;;  %v962_v23 = vld [vmem:[%s2758_s4 + $0x50] sm:$0xff] (!%p1610_p13)  ;;  %v963_v24 = vld [vmem:[%s2758_s4 + $0x58] sm:$0xff] (!%p1610_p13)  ;;  %851 = vperm.xlu1 (!%p1610_p13), %2177, %v797_v17   ;;  %2204 = vrcp.f32 (!%p1610_p13), %v2545_v22  ;;  %2007 = vmatprep.subr.bf16.mxu0 (!%p1610_p13), %v2006_v19  ;;  %vm757_vm14 = vcmp.gt.f32.partialorder (!%p1610_p13), %v2542_v18, 0.0  ;;  %v932_v8 = vld [vmem:[%s2376_s17 + $0x60] sm:$0xff] (!%p1610_p13) }
 0x13c   : > { %634 = vst [vmem:[#allocation2 + $0x38] sm:$0xff] %v618_v27  ;;  %642 = vst [vmem:[#allocation2 + $0x78] sm:$0xff] %v626_v28  ;;  %v2191_v20 = vpop.eup (!%p1610_p13), %2190  ;;  %v796_v21 = vsel (!%p1610_p13), %vm748_vm7, %v2189_v13, 0.0  ;;  %v944_v27 = vld [vmem:[%s2757_s3 + $0x40] sm:$0xff] (!%p1610_p13)  ;;  %v945_v28 = vld [vmem:[%s2757_s3 + $0x48] sm:$0xff] (!%p1610_p13)  ;;  %2096 = vmatpush3.bf16.msra.mxu1 (!%p1610_p13), %v2532_v14  ;;  %2009 = vmatpush3.bf16.msra.mxu0 (!%p1610_p13), %v2006_v19  ;;  %vm756_vm15 = vcmp.gt.f32.partialorder (!%p1610_p13), %v2545_v22, 0.0 }
 0x13d   : > { %641 = vst [vmem:[#allocation2 + $0x70] sm:$0xff] %v625_v31  ;;  %633 = vst [vmem:[#allocation2 + $0x30] sm:$0xff] %v617_v32  ;;  %v2193_v25 = vpop.eup (!%p1610_p13), %2192  ;;  %846 = vperm.xlu0 (!%p1610_p13), %2176, %v796_v21   ;;  %v799_v29 = vsel (!%p1610_p13), %vm751_vm8, %v2191_v20, 0.0  ;;  %v2566_v30 = vld [vmem:[#allocation3 + $0x78] sm:$0xff] (!%p1610_p13)  ;;  %v2010_v31 = vpack.c.bf16 (!%p1610_p13), %v963_v24, %v962_v23  ;;  %2089 = vmatprep.subr.bf16.mxu1 (!%p1610_p13), %v2556_v26  ;;  %v2580_v38 = vpack.c.bf16 (!%p1610_p13), %v945_v28, %v944_v27  ;;  %v933_v9 = vld [vmem:[%s2376_s17 + $0x68] sm:$0xff] (!%p1610_p13)  ;;  %vm1476_vm3 = vcmask (!%p1610_p13), 64512  }
 0x13e   : > { %v2195_v32 = vpop.eup %2194  ;;  %v798_v33 = vsel %vm750_vm9, %v2193_v25, 0.0  ;;  %2206 = vrcp.f32 %v2566_v30  ;;  %vm759_vm0 = vcmp.gt.f32.partialorder %v2566_v30, 0.0  ;;  %v934_v10 = vld [vmem:[%s2376_s17 + $0x70] sm:$0xff]  ;;  %v935_v11 = vld [vmem:[%s2376_s17 + $0x78] sm:$0xff]  ;;  %v808_v12 = vld [vmem:[#allocation2] sm:$0xff] }
 0x13f   : > { %v2197_v37 = vpop.eup %2196  ;;  %861 = vperm.xlu1 %2177, %v799_v29   ;;  %v801_v41 = vsel %vm753_vm10, %v2195_v32, 0.0  ;;  %2208 = vrcp.f32 %v2569_v34  ;;  %2011 = vmatprep.subr.bf16.mxu0 %v2010_v31  ;;  %v810_v16 = vld [vmem:[#allocation2 + $0x10] sm:$0xff]  ;;  %v809_v18 = vld [vmem:[#allocation2 + $0x8] sm:$0xff]  ;;  %v811_v23 = vld [vmem:[#allocation2 + $0x18] sm:$0xff] }
 0x140   : > { %v2199_v43 = vpop.eup %2198  ;;  %v800_v44 = vsel %vm752_vm11, %v2197_v37, 0.0  ;;  %2097 = vmatpush3.bf16.msra.mxu1 %v2556_v26  ;;  %2013 = vmatpush3.bf16.msra.mxu0 %v2010_v31  ;;  %v812_v24 = vld [vmem:[#allocation2 + $0x20] sm:$0xff]  ;;  %v813_v30 = vld [vmem:[#allocation2 + $0x28] sm:$0xff] }
 0x141   : > { %856 = vperm.xlu0 %2176, %v798_v33   ;;  %v2201_v47 = vpop.eup %2200  ;;  %2090 = vmatprep.subr.bf16.mxu1 %v2580_v38  ;;  %v803_v51 = vsel %vm755_vm12, %v2199_v43, 0.0 }
 0x142   : > { %2015 = vmatprep.subr.bf16.mxu0 %v2014_v42  ;;  %v802_v55 = vsel %vm754_vm13, %v2201_v47, 0.0  ;;  %v819_v47 = vld [vmem:[#allocation2 + $0x58] sm:$0xff] }
 0x143   : > { %871 = vperm.xlu1 %2177, %v801_v41   ;;  %v815_v36 = vld [vmem:[#allocation2 + $0x38] sm:$0xff] }
 0x144   : > { %v2203_v53 = vpop.eup %2202  ;;  %2098 = vmatpush3.bf16.msra.mxu1 %v2580_v38  ;;  %2017 = vmatpush3.bf16.msra.mxu0 %v2014_v42  ;;  %v814_v31 = vld [vmem:[#allocation2 + $0x30] sm:$0xff]  ;;  %v817_v42 = vld [vmem:[#allocation2 + $0x48] sm:$0xff] }
 0x145   : > { %866 = vperm.xlu0 %2176, %v800_v44   ;;  %v2205_v56 = vpop.eup %2204  ;;  %2091 = vmatprep.subr.bf16.mxu1 %v2600_v48  ;;  %v805_v60 = vsel %vm757_vm14, %v2203_v53, 0.0  ;;  %v821_v53 = vld [vmem:[#allocation2 + $0x68] sm:$0xff] }
 0x146   : > { %2019 = vmatprep.subr.bf16.mxu0 %v2018_v52  ;;  %v804_v0 = vsel %vm756_vm15, %v2205_v56, 0.0 }
 0x147   : > { %881 = vperm.xlu1 %2177, %v803_v51  }
 0x148   : > { %v2207_v62 = vpop.eup %2206  ;;  %2099 = vmatpush3.bf16.msra.mxu1 %v2600_v48  ;;  %2021 = vmatpush3.bf16.msra.mxu0 %v2018_v52 }
 0x149   : > { %876 = vperm.xlu0 %2176, %v802_v55   ;;  %v2209_v1 = vpop.eup %2208  ;;  %2092 = vmatprep.subr.bf16.mxu1 %v2612_v57  ;;  %v807_v3 = vsel %vm759_vm0, %v2207_v62, 0.0  ;;  %v922_v62 = vld [vmem:[%s2376_s17 + $0x10] sm:$0xff] }
 0x14a   : > { %2023 = vmatprep.subr.bf16.mxu0 %v2487_v54  ;;  %v806_v4 = vsel %vm758_vm1, %v2209_v1, 0.0  ;;  %v924_v1 = vld [vmem:[%s2376_s17 + $0x20] sm:$0xff] }
 0x14b   : > { %891 = vperm.xlu1 %2177, %v805_v60  }
 0x14c   : > { %2100 = vmatpush3.bf16.msra.mxu1 %v2612_v57 }
 0x14d   : > { %886 = vperm.xlu0 %2176, %v804_v0   ;;  %2093 = vmatprep.subr.bf16.mxu1 %v2625_v2  ;;  %v923_v0 = vld [vmem:[%s2376_s17 + $0x18] sm:$0xff] }
 0x14f   : > { %901 = vperm.xlu1 %2177, %v807_v3   ;;  %v926_v3 = vld [vmem:[%s2376_s17 + $0x30] sm:$0xff] }
 0x150   : > { %2101 = vmatpush3.bf16.msra.mxu1 %v2625_v2 }
 0x151   : > { %896 = vperm.xlu0 %2176, %v806_v4   ;;  %v927_v4 = vld [vmem:[%s2376_s17 + $0x38] sm:$0xff] }
 0x153   : > { %1907 = vmatmul.mubr.f32.vlgmr.msra.gmra.mrb[0].mxu1 %v929_v5  ;;  %v1274_v5 = vld [vmem:[%s2759_s5] sm:$0xff] }
 0x154   : > { %1909 = vmatprep.mubr.f32.mxu1 %v930_v6 }
 0x157   : > { %1910 = vmatmul.mubr.f32.gmra.mrb[2].mxu1 %v931_v7  ;;  %v1276_v7 = vld [vmem:[%s2759_s5 + $0x10] sm:$0xff] }
 0x158   : > { %1912 = vmatprep.mubr.f32.mxu1 %v932_v8  ;;  %v1277_v8 = vld [vmem:[%s2759_s5 + $0x18] sm:$0xff] }
 0x15b   : > { %1913 = vmatmul.mubr.f32.gmra.mrb[4].mxu1 %v933_v9  ;;  %v2058_v9 = vpack.c.bf16 %v1277_v8, %v1276_v7 }
 0x15c   : > { %1915 = vmatprep.mubr.f32.mxu1 %v934_v10 }
 0x15f   : > { %1916 = vmatmul.mubr.f32.gmra.mrb[6].mxu1 %v935_v11  ;;  %v1278_v11 = vld [vmem:[%s2759_s5 + $0x20] sm:$0xff] }
 0x1b2   : > { %v837_v13 = vpop.permute.xlu1 %836 }
 0x1b3   : > { %v906_v20 = vmul.f32 %v837_v13, %v810_v16 }
 0x1b4   : > { %v827_v15 = vpop.permute.xlu0 %826 }
 0x1b5   : > { %v904_v17 = vmul.f32 %v827_v15, %v808_v12  ;;  %v1279_v12 = vld [vmem:[%s2759_s5 + $0x28] sm:$0xff] }
 0x1b6   : > { %v842_v19 = vpop.permute.xlu1 %841  ;;  %v2062_v15 = vpack.c.bf16 %v1279_v12, %v1278_v11 }
 0x1b7   : > { %1838 = vmatprep.mubr.f32.mxu0 %v904_v17  ;;  %v907_v28 = vmul.f32 %v842_v19, %v811_v23  ;;  %v1280_v17 = vld [vmem:[%s2759_s5 + $0x30] sm:$0xff] }
 0x1b8   : > { %v832_v21 = vpop.permute.xlu0 %831 }
 0x1b9   : > { %v905_v22 = vmul.f32 %v832_v21, %v809_v18  ;;  %v1281_v18 = vld [vmem:[%s2759_s5 + $0x38] sm:$0xff] }
 0x1ba   : > { %v852_v25 = vpop.permute.xlu1 %851 }
 0x1bb   : > { %1839 = vmatmul.mubr.f32.vlgmr.msra.gmra.mrb[0].mxu0 %v905_v22  ;;  %v909_v34 = vmul.f32 %v852_v25, %v813_v30 }
 0x1bc   : > { %2025 = vmatpush3.bf16.msra.mxu0 %v2487_v54  ;;  %1841 = vmatprep.mubr.f32.mxu0 %v906_v20  ;;  %v847_v27 = vpop.permute.xlu0 %846  ;;  %v816_v54 = vld [vmem:[#allocation2 + $0x40] sm:$0xff]  ;;  %v2066_v20 = vpack.c.bf16 %v1281_v18, %v1280_v17 }
 0x1bd   : > { %v908_v29 = vmul.f32 %v847_v27, %v812_v24  ;;  %2027 = vmatprep.subr.bf16.mxu0 %v2505_v63 }
 0x1be   : > { %v862_v32 = vpop.permute.xlu1 %861 }
 0x1bf   : > { %1842 = vmatmul.mubr.f32.gmra.mrb[2].mxu0 %v907_v28  ;;  %v911_v40 = vmul.f32 %v862_v32, %v815_v36 }
 0x1c0   : > { %2029 = vmatpush3.bf16.msra.mxu0 %v2505_v63  ;;  %1844 = vmatprep.mubr.f32.mxu0 %v908_v29  ;;  %v857_v33 = vpop.permute.xlu0 %856  ;;  %v818_v63 = vld [vmem:[#allocation2 + $0x50] sm:$0xff] }
 0x1c1   : > { %v910_v35 = vmul.f32 %v857_v33, %v814_v31  ;;  %2031 = vmatprep.subr.bf16.mxu0 %v2532_v14 }
 0x1c2   : > { %v872_v37 = vpop.permute.xlu1 %871 }
 0x1c3   : > { %1845 = vmatmul.mubr.f32.gmra.mrb[4].mxu0 %v909_v34  ;;  %v913_v45 = vmul.f32 %v872_v37, %v817_v42 }
 0x1c4   : > { %2033 = vmatpush3.bf16.msra.mxu0 %v2532_v14  ;;  %1847 = vmatprep.mubr.f32.mxu0 %v910_v35  ;;  %v867_v39 = vpop.permute.xlu0 %866  ;;  %v820_v14 = vld [vmem:[#allocation2 + $0x60] sm:$0xff] }
 0x1c5   : > { %v912_v41 = vmul.f32 %v867_v39, %v816_v54  ;;  %2035 = vmatprep.subr.bf16.mxu0 %v2556_v26 }
 0x1c6   : > { %v882_v43 = vpop.permute.xlu1 %881 }
 0x1c7   : > { %1848 = vmatmul.mubr.f32.gmra.mrb[6].mxu0 %v911_v40  ;;  %v915_v51 = vmul.f32 %v882_v43, %v819_v47 }
 0x1c8   : > { %2037 = vmatpush3.bf16.msra.mxu0 %v2556_v26  ;;  %1850 = vmatprep.mubr.f32.mxu0 %v912_v41  ;;  %v877_v44 = vpop.permute.xlu0 %876  ;;  %v822_v26 = vld [vmem:[#allocation2 + $0x70] sm:$0xff] }
 0x1c9   : > { %v914_v46 = vmul.f32 %v877_v44, %v818_v63  ;;  %2039 = vmatprep.subr.bf16.mxu0 %v2580_v38 }
 0x1ca   : > { %v892_v49 = vpop.permute.xlu1 %891 }
 0x1cb   : > { %1851 = vmatmul.mubr.f32.gmra.mrb[8].mxu0 %v913_v45  ;;  %v917_v56 = vmul.f32 %v892_v49, %v821_v53 }
 0x1cc   : > { %2041 = vmatpush3.bf16.msra.mxu0 %v2580_v38  ;;  %1853 = vmatprep.mubr.f32.mxu0 %v914_v46  ;;  %v887_v50 = vpop.permute.xlu0 %886  ;;  %v823_v38 = vld [vmem:[#allocation2 + $0x78] sm:$0xff] }
 0x1cd   : > { %v916_v52 = vmul.f32 %v887_v50, %v820_v14  ;;  %2043 = vmatprep.subr.bf16.mxu0 %v2600_v48 }
 0x1ce   : > { %v902_v59 = vpop.permute.xlu1 %901 }
 0x1cf   : > { %1854 = vmatmul.mubr.f32.gmra.mrb[10].mxu0 %v915_v51  ;;  %v919_v60 = vmul.f32 %v902_v59, %v823_v38 }
 0x1d0   : > { %2045 = vmatpush3.bf16.msra.mxu0 %v2600_v48  ;;  %1856 = vmatprep.mubr.f32.mxu0 %v916_v52  ;;  %v897_v55 = vpop.permute.xlu0 %896  ;;  %v920_v48 = vld [vmem:[%s2376_s17] sm:$0xff] }
 0x1d1   : > { %v918_v58 = vmul.f32 %v897_v55, %v822_v26  ;;  %2047 = vmatprep.subr.bf16.mxu0 %v2612_v57 }
 0x1d3   : > { %1857 = vmatmul.mubr.f32.gmra.mrb[12].mxu0 %v917_v56 }
 0x1d4   : > { %2049 = vmatpush3.bf16.msra.mxu0 %v2612_v57  ;;  %1859 = vmatprep.mubr.f32.mxu0 %v918_v58  ;;  %v925_v57 = vld [vmem:[%s2376_s17 + $0x28] sm:$0xff] }
 0x1d5   : > { %2051 = vmatprep.subr.bf16.mxu0 %v2625_v2 }
 0x1d7   : > { %1860 = vmatmul.mubr.f32.gmra.mrb[14].mxu0 %v919_v60 }
 0x1d8   : > { %2053 = vmatpush3.bf16.msra.mxu0 %v2625_v2  ;;  %1894 = vmatprep.mubr.f32.mxu0 %v920_v48  ;;  %v1275_v2 = vld [vmem:[%s2759_s5 + $0x8] sm:$0xff] }
 0x1d9   : > { %v2054_v6 = vpack.c.bf16 %v1275_v2, %v1274_v5 }
 0x1db   : > { %1895 = vmatmul.mubr.f32.vlgmr.msra.gmra.mrb[0].mxu0 %v921_v61  ;;  %2055 = vmatprep.subr.bf16.mxu1 %v2054_v6 }
 0x1dc   : > { %1897 = vmatprep.mubr.f32.mxu0 %v922_v62  ;;  %2057 = vmatpush3.bf16.msra.mxu1 %v2054_v6 }
 0x1dd   : > { %2059 = vmatprep.subr.bf16.mxu1 %v2058_v9 }
 0x1df   : > { %1898 = vmatmul.mubr.f32.gmra.mrb[2].mxu0 %v923_v0 }
 0x1e0   : > { %1900 = vmatprep.mubr.f32.mxu0 %v924_v1  ;;  %2061 = vmatpush3.bf16.msra.mxu1 %v2058_v9 }
 0x1e1   : > { %2063 = vmatprep.subr.bf16.mxu1 %v2062_v15 }
 0x1e3   : > { %1901 = vmatmul.mubr.f32.gmra.mrb[4].mxu0 %v925_v57 }
 0x1e4   : > { %1903 = vmatprep.mubr.f32.mxu0 %v926_v3  ;;  %2065 = vmatpush3.bf16.msra.mxu1 %v2062_v15 }
 0x1e5   : > { %2067 = vmatprep.subr.bf16.mxu1 %v2066_v20 }
 0x1e7   : > { %1904 = vmatmul.mubr.f32.gmra.mrb[6].mxu0 %v927_v4 }
 0x1e8   : > { %2069 = vmatpush3.bf16.msra.mxu1 %v2066_v20 }
 0x226   : > { %v1908_v10 = vpop.f32.mrb[0].mxu1 }
 0x227   : > { %v1219_v13 = vpop.f32.mrb[1].mxu1 }
 0x22a   : > { %v1911_v16 = vpop.f32.mrb[2].mxu1 }
 0x22b   : > { %v1229_v19 = vpop.f32.mrb[3].mxu1 }
 0x22e   : > { %v1914_v21 = vpop.f32.mrb[4].mxu1 }
 0x22f   : > { %v1239_v22 = vpop.f32.mrb[5].mxu1 }
 0x232   : > { %v1917_v23 = vpop.f32.mrb[6].mxu1 }
 0x233   : > { %v1249_v24 = vpop.f32.mrb[7].mxu1 }
 0x29e   : > { %v1852_v25 = vpop.f32.mrb[8].mxu0 }
 0x29f   : > { %v1225_v27 = vadd.f32 %v1908_v10, %v1852_v25  ;;  %v1074_v28 = vpop.f32.mrb[9].mxu0 }
 0x2a0   : > { %v1220_v29 = vadd.f32 %v1219_v13, %v1074_v28 }
 0x2a1   : > { %v1267_v38 = vmax.f32 %v1225_v27, 0.0 }
 0x2a2   : > { %v1855_v30 = vpop.f32.mrb[10].mxu0  ;;  %v1266_v58 = vmax.f32 %v1220_v29, 0.0 }
 0x2a3   : > { %v1235_v31 = vadd.f32 %v1911_v16, %v1855_v30  ;;  %v1084_v32 = vpop.f32.mrb[11].mxu0 }
 0x2a4   : > { %v1230_v33 = vadd.f32 %v1229_v19, %v1084_v32 }
 0x2a5   : > { %v1269_v60 = vmax.f32 %v1235_v31, 0.0 }
 0x2a6   : > { %v1858_v34 = vpop.f32.mrb[12].mxu0  ;;  %v1268_v59 = vmax.f32 %v1230_v33, 0.0 }
 0x2a7   : > { %v1245_v35 = vadd.f32 %v1914_v21, %v1858_v34  ;;  %v1094_v36 = vpop.f32.mrb[13].mxu0 }
 0x2a8   : > { %v1240_v54 = vadd.f32 %v1239_v22, %v1094_v36 }
 0x2a9   : > { %v1271_v61 = vmax.f32 %v1245_v35, 0.0 }
 0x2aa   : > { %v1861_v37 = vpop.f32.mrb[14].mxu0  ;;  %v1270_v48 = vmax.f32 %v1240_v54, 0.0 }
 0x2ab   : > { %v1255_v39 = vadd.f32 %v1917_v23, %v1861_v37  ;;  %v1104_v40 = vpop.f32.mrb[15].mxu0 }
 0x2ac   : > { %v1250_v41 = vadd.f32 %v1249_v24, %v1104_v40 }
 0x2ad   : > { %v1273_v0 = vmax.f32 %v1255_v39, 0.0 }
 0x2ae   : > { %v1896_v42 = vpop.f32.mrb[0].mxu0  ;;  %v1272_v62 = vmax.f32 %v1250_v41, 0.0 }
 0x2af   : > { %v1179_v63 = vpop.f32.mrb[1].mxu0  ;;  %v1259_v44 = vmax.f32 %v1896_v42, 0.0 }
 0x2b0   : > { %v1258_v43 = vmax.f32 %v1179_v63, 0.0 }
 0x2b2   : > { %v1899_v45 = vpop.f32.mrb[2].mxu0  ;;  %1934 = vmatprep.mubr.msk.f32.mxu1 %vm1282_vm2, %v1258_v43 }
 0x2b3   : > { %v1189_v46 = vpop.f32.mrb[3].mxu0  ;;  %1935 = vmatmul.mubr.msk.f32.vlgmr.msra.gmra.mrb[8].mxu1 %vm1282_vm2, %v1259_v44  ;;  %v1261_v14 = vmax.f32 %v1899_v45, 0.0 }
 0x2b4   : > { %v1260_v47 = vmax.f32 %v1189_v46, 0.0 }
 0x2b6   : > { %v1902_v49 = vpop.f32.mrb[4].mxu0  ;;  %1937 = vmatprep.mubr.msk.f32.mxu1 %vm1282_vm2, %v1260_v47 }
 0x2b7   : > { %v1199_v50 = vpop.f32.mrb[5].mxu0  ;;  %1938 = vmatmul.mubr.msk.f32.gmra.mrb[10].mxu1 %vm1282_vm2, %v1261_v14  ;;  %v1263_v52 = vmax.f32 %v1902_v49, 0.0 }
 0x2b8   : > { %v1262_v51 = vmax.f32 %v1199_v50, 0.0 }
 0x2ba   : > { %v1905_v53 = vpop.f32.mrb[6].mxu0  ;;  %1940 = vmatprep.mubr.msk.f32.mxu1 %vm1282_vm2, %v1262_v51 }
 0x2bb   : > { %v1209_v26 = vpop.f32.mrb[7].mxu0  ;;  %1941 = vmatmul.mubr.msk.f32.gmra.mrb[12].mxu1 %vm1282_vm2, %v1263_v52  ;;  %v1265_v56 = vmax.f32 %v1905_v53, 0.0 }
 0x2bc   : > { %v1264_v55 = vmax.f32 %v1209_v26, 0.0 }
 0x2be   : > { %1943 = vmatprep.mubr.msk.f32.mxu1 %vm1282_vm2, %v1264_v55 }
 0x2bf   : > { %1944 = vmatmul.mubr.msk.f32.gmra.mrb[14].mxu1 %vm1282_vm2, %v1265_v56 }
 0x2c0   : > { %1946 = vmatprep.mubr.msk.f32.mxu1 %vm1282_vm2, %v1266_v58 }
 0x2c3   : > { %1947 = vmatmul.mubr.msk.f32.gmra.mrb[16].mxu1 %vm1282_vm2, %v1267_v38 }
 0x2c4   : > { %1949 = vmatprep.mubr.msk.f32.mxu1 %vm1282_vm2, %v1268_v59 }
 0x2c7   : > { %1950 = vmatmul.mubr.msk.f32.gmra.mrb[18].mxu1 %vm1282_vm2, %v1269_v60 }
 0x2c8   : > { %1952 = vmatprep.mubr.msk.f32.mxu1 %vm1282_vm2, %v1270_v48 }
 0x2cb   : > { %1953 = vmatmul.mubr.msk.f32.gmra.mrb[20].mxu1 %vm1282_vm2, %v1271_v61 }
 0x2cc   : > { %1955 = vmatprep.mubr.msk.f32.mxu1 %vm1282_vm2, %v1272_v62 }
 0x2cf   : > { %1956 = vmatmul.mubr.msk.f32.gmra.mrb[22].mxu1 %vm1282_vm2, %v1273_v0 }
 0x386   : > { %v1936_v1 = vpop.f32.mrb[8].mxu1 }
 0x387   : > { %1478 = vst.msk [vmem:[%s2381_s19 + $0x8] sm:$0xff] %vm1476_vm3, %v1936_v1  ;;  %v1397_v57 = vpop.f32.mrb[9].mxu1 }
 0x388   : > { %1477 = vst.msk [vmem:[%s2381_s19] sm:$0xff] %vm1476_vm3, %v1397_v57 }
 0x38a   : > { %v1939_v3 = vpop.f32.mrb[10].mxu1 }
 0x38b   : > { %1480 = vst.msk [vmem:[%s2381_s19 + $0x18] sm:$0xff] %vm1476_vm3, %v1939_v3  ;;  %v1407_v4 = vpop.f32.mrb[11].mxu1 }
 0x38c   : > { %1479 = vst.msk [vmem:[%s2381_s19 + $0x10] sm:$0xff] %vm1476_vm3, %v1407_v4 }
 0x38e   : > { %v1942_v5 = vpop.f32.mrb[12].mxu1 }
 0x38f   : > { %1482 = vst.msk [vmem:[%s2381_s19 + $0x28] sm:$0xff] %vm1476_vm3, %v1942_v5  ;;  %v1417_v2 = vpop.f32.mrb[13].mxu1 }
 0x390   : > { %1481 = vst.msk [vmem:[%s2381_s19 + $0x20] sm:$0xff] %vm1476_vm3, %v1417_v2 }
 0x392   : > { %v1945_v6 = vpop.f32.mrb[14].mxu1 }
 0x393   : > { %1484 = vst.msk [vmem:[%s2381_s19 + $0x38] sm:$0xff] %vm1476_vm3, %v1945_v6  ;;  %v1427_v7 = vpop.f32.mrb[15].mxu1 }
 0x394   : > { %1483 = vst.msk [vmem:[%s2381_s19 + $0x30] sm:$0xff] %vm1476_vm3, %v1427_v7 }
 0x396   : > { %v1948_v8 = vpop.f32.mrb[16].mxu1 }
 0x397   : > { %1486 = vst.msk [vmem:[%s2381_s19 + $0x48] sm:$0xff] %vm1476_vm3, %v1948_v8  ;;  %v1437_v9 = vpop.f32.mrb[17].mxu1 }
 0x398   : > { %1485 = vst.msk [vmem:[%s2381_s19 + $0x40] sm:$0xff] %vm1476_vm3, %v1437_v9 }
 0x39a   : > { %v1951_v10 = vpop.f32.mrb[18].mxu1 }
 0x39b   : > { %1488 = vst.msk [vmem:[%s2381_s19 + $0x58] sm:$0xff] %vm1476_vm3, %v1951_v10  ;;  %v1447_v11 = vpop.f32.mrb[19].mxu1 }
 0x39c   : > { %1487 = vst.msk [vmem:[%s2381_s19 + $0x50] sm:$0xff] %vm1476_vm3, %v1447_v11 }
 0x39e   : > { %v1954_v12 = vpop.f32.mrb[20].mxu1 }
 0x39f   : > { %1490 = vst.msk [vmem:[%s2381_s19 + $0x68] sm:$0xff] %vm1476_vm3, %v1954_v12  ;;  %v1457_v13 = vpop.f32.mrb[21].mxu1 }
 0x3a0   : > { %1489 = vst.msk [vmem:[%s2381_s19 + $0x60] sm:$0xff] %vm1476_vm3, %v1457_v13 }
 0x3a2   : > { %v1957_v15 = vpop.f32.mrb[22].mxu1 }
 0x3a3   : > { %1492 = vst.msk [vmem:[%s2381_s19 + $0x78] sm:$0xff] %vm1476_vm3, %v1957_v15  ;;  %v1467_v16 = vpop.f32.mrb[23].mxu1 }
 0x3a4   : > { %1491 = vst.msk [vmem:[%s2381_s19 + $0x70] sm:$0xff] %vm1476_vm3, %v1467_v16 }
 0x3a5 PF: > { %s16_s27 = sadd.s32 1, %s2264_s27   ;;  %s2761_s21 = smov %s2244_s22 }
 0x3a6   : > { %p13_p0 = scmp.ge.s32.totalorder %s16_s27, 6   ;;  %s2762_s22 = smov %s2354_s10 }
 0x3a7   : > { %s2763_s23 = smov %s2256_s25  ;;  %s2764_s24 = smov %s2260_s26 }
 0x3a8   : > { %s2765_s25 = smov %s2768_s28  ;;  %s2766_s26 = smov %s2772_s29 }
 0x3a9   :  { %15 = sbr.rel (!%p13_p0) target bundleno = 4 (0x4), region = 131 }

</bundles_post_ra>
